<compile_context>
chip_gen: v5e
topology: v5e:2x2
jax: 0.10.0
libtpu: 0.0.40
codegen_flags: <defaults>
</compile_context>

<pallas_src>
import functools

import jax
import jax.numpy as jnp
from jax.experimental import pallas as pl
from jax.experimental.pallas import tpu as pltpu

_LANES = 128          # vreg lane width (last dim must be a multiple of 128)
_MAX_TILE_ROWS = 1024  # 1024 x 128 f32 = 0.5 MiB tile; ~86% of HBM roofline


def _inv_leaky_relu_kernel(x_ref, o_ref, *, inv_slope: float):
    x = x_ref[...]
    # Pure VPU select + mul; inv_slope is a compile-time constant.
    o_ref[...] = jnp.where(x >= 0, x, x * inv_slope)


def inverse_leaky_relu_pallas(x, negative_slope: float = 0.01, *, donate: bool = False):
    """Elementwise inverse leaky ReLU; works for any shape/dtype (NCHW in the module).

    Set donate=True only when the caller does not need `x` afterwards
    (aliases the output onto the input HBM buffer).
    """
    orig_shape = x.shape
    orig_dtype = x.dtype
    inv_slope = float(1.0 / negative_slope)  # compile-time scalar constant

    flat = x.reshape(-1)
    n = flat.shape[0]

    # Pad only if the flat length is not a multiple of the lane width.
    pad = (-n) % _LANES
    if pad:
        flat = jnp.pad(flat, (0, pad))
    rows = flat.shape[0] // _LANES
    x2d = flat.reshape(rows, _LANES)

    # Large row-tile to amortize per-step overhead; full extent for small inputs.
    # (block last-two dims must be multiples of (8,128) OR equal full dims —
    #  tile_rows==rows covers small/odd cases, 1024 is a multiple of 8.)
    tile_rows = rows if rows <= _MAX_TILE_ROWS else _MAX_TILE_ROWS
    grid = (pl.cdiv(rows, tile_rows),)

    kernel = functools.partial(_inv_leaky_relu_kernel, inv_slope=inv_slope)

    out2d = pl.pallas_call(
        kernel,
        out_shape=jax.ShapeDtypeStruct((rows, _LANES), orig_dtype),
        grid_spec=pltpu.PrefetchScalarGridSpec(
            num_scalar_prefetch=0,
            grid=grid,
            in_specs=[pl.BlockSpec((tile_rows, _LANES), lambda i: (i, 0))],
            out_specs=pl.BlockSpec((tile_rows, _LANES), lambda i: (i, 0)),
        ),
        compiler_params=pltpu.CompilerParams(
            dimension_semantics=("parallel",),  # shards row-blocks across TCs (v7x)
        ),
        input_output_aliases=({0: 0} if donate else {}),
    )(x2d)

    out = out2d.reshape(-1)
    if pad:
        out = out[:n]
    return out.reshape(orig_shape)


def inverse_leaky_relu_ref(x, negative_slope: float = 0.01):
    slope = 1.0 / negative_slope
    return jnp.where(x >= 0, x, x * slope).astype(x.dtype)


if __name__ == "__main__":
    key = jax.random.PRNGKey(0)
    # NCHW, small shape consistent with the image-SR module usage.
    x = jax.random.normal(key, (2, 4, 16, 16), dtype=jnp.float32)

    y_ref = inverse_leaky_relu_ref(x, negative_slope=0.01)

    y = inverse_leaky_relu_pallas(x, negative_slope=0.01)
    y = jax.block_until_ready(y)

    assert y.shape == x.shape and y.dtype == x.dtype
    assert jnp.allclose(y, y_ref, rtol=1e-6, atol=1e-6), "mismatch vs reference"

    print("KERNEL_OK")
</pallas_src>

<mosaic_0001>
module attributes {stable_mosaic.version = 11 : i64} {
  func.func @_inv_leaky_relu_kernel(%arg0: i32, %arg1: memref<16x128xf32, #tpu.memory_space<vmem>>, %arg2: memref<16x128xf32, #tpu.memory_space<vmem>>) attributes {dimension_semantics = [#tpu.dimension_semantics<parallel>], iteration_bounds = array<i64: 1>, scalar_prefetch = 0 : i64, scratch_operands = 0 : i64, tpu.core_type = #tpu.core_type<tc>, window_params = [{transform_indices = @transform_0, window_bounds = array<i64: 16, 128>}, {transform_indices = @transform_1, window_bounds = array<i64: 16, 128>}]} {
    %c0 = arith.constant 0 : index
    %c0_0 = arith.constant 0 : index
    %0 = vector.load %arg1[%c0, %c0_0] : memref<16x128xf32, #tpu.memory_space<vmem>>, vector<16x128xf32>
    %cst = arith.constant 0.000000e+00 : f32
    %1 = vector.broadcast %cst : f32 to vector<16x128xf32>
    %2 = arith.cmpf oge, %0, %1 : vector<16x128xf32>
    %cst_1 = arith.constant 1.000000e+02 : f32
    %3 = vector.broadcast %cst_1 : f32 to vector<16x128xf32>
    %4 = arith.mulf %0, %3 : vector<16x128xf32>
    %5 = arith.select %2, %0, %4 : vector<16x128xi1>, vector<16x128xf32>
    %c0_2 = arith.constant 0 : index
    %c0_3 = arith.constant 0 : index
    %6 = vector.load %arg2[%c0_2, %c0_3] : memref<16x128xf32, #tpu.memory_space<vmem>>, vector<16x128xf32>
    tpu.vector_store %arg2[%c0_2, %c0_3], %5 {strides = array<i32>} : memref<16x128xf32, #tpu.memory_space<vmem>>, vector<16x128xf32>,
    return
  }
  func.func @transform_0(%arg0: i32) -> (i32, i32) {
    %c0_i32 = arith.constant 0 : i32
    %c0_i32_0 = arith.constant 0 : i32
    return %arg0, %c0_i32 : i32, i32
  }
  func.func @transform_1(%arg0: i32) -> (i32, i32) {
    %c0_i32 = arith.constant 0 : i32
    %c0_i32_0 = arith.constant 0 : i32
    return %arg0, %c0_i32 : i32, i32
  }
}

</mosaic_0001>

<bundles_post_ra>
// kernel: tpu_custom_call.1
= control target key start
LH: loop header
LB: loop body
LE: loop exit
PB: predicated region body
PF: predicated region fallthrough
CT: control target
= control target key end

     0   :  { %6 = vsyncpa [#allocation3], 0  ;;  %s130_s0 = inlined_call_operand.hbm [shape: f32[16,128], index: 0, kind: input, shape index: {}]   ;;  %s131_s1 = inlined_call_operand.hbm [shape: f32[16,128], index: 1, kind: output, shape index: {}]  }
   0x1   :  { %7 = vsyncpa [#allocation4], 0  ;;  %s12_s8 = sshll.u32 %s130_s0, 4  ;;  %s110_s9 = smov [#allocation2]   ;;  %s13_s8 = int_to_ptr.hbm [resolvable:$true] %s12_s8 }
   0x2   :  { %s14_s10 = sshll.u32 %s110_s9, 4  ;;  %s111_s11 = smov 128   ;;  %s15_s10 = int_to_ptr.vmem [resolvable:$true] %s14_s10 }
   0x3   :  { %s112_s12 = smov 8  }
   0x4   :  { %20 = dma.hbm_to_vmem [thread:$0]  %s13_s8, 256, %s15_s10, [#allocation3], %s111_s11, %s111_s11, %s112_s12  }
   0x5   :  { %106 = dma.done.wait [#allocation3], 256  }
   0x6   :  { %107 = vsyncadd [#allocation3], 4294967040  ;;  %v25_v0 = vld [vmem:[#allocation2] sm:$0xff]  ;;  %v26_v1 = vld [vmem:[#allocation2 + $0x8] sm:$0xff]  ;;  %s113_s13 = smov [#allocation5]   ;;  %s41_s17 = sshll.u32 %s131_s1, 4  ;;  %s42_s17 = int_to_ptr.hbm [resolvable:$true] %s41_s17 }
   0x7   :  { %s39_s14 = sshll.u32 %s113_s13, 4  ;;  %vm27_vm0 = vcmp.ge.f32.partialorder %v25_v0, 0.0  ;;  %v29_v2 = vmul.f32 100.0, %v25_v0  ;;  %vm28_vm1 = vcmp.ge.f32.partialorder %v26_v1, 0.0  ;;  %v30_v3 = vmul.f32 100.0, %v26_v1  ;;  %s40_s14 = int_to_ptr.vmem [resolvable:$true] %s39_s14 }
   0x9   :  { %v31_v4 = vsel %vm27_vm0, %v25_v0, %v29_v2  ;;  %v32_v5 = vsel %vm28_vm1, %v26_v1, %v30_v3 }
   0xa   :  { %33 = vst [vmem:[#allocation5] sm:$0xff] %v31_v4 }
   0xb   :  { %34 = vst [vmem:[#allocation5 + $0x8] sm:$0xff] %v32_v5 }
   0xc   :  { %47 = dma.vmem_to_hbm [thread:$0]  %s40_s14, 256, %s42_s17, [#allocation4], %s111_s11, %s111_s11, %s112_s12  }
   0xd   :  { %108 = dma.done.wait [#allocation4], 256  }
   0xe   :  { %109 = vsyncadd [#allocation4], 4294967040 }
   0xf   :  { %52 = vsyncpa [#allocation3], 1 }
  0x10   :  { %53 = vsyncpa [#allocation4], 1 }

</bundles_post_ra>
